<compile_context>
chip_gen: v7x
topology: tpu7x:2x2x1
jax: 0.10.0
libtpu: 0.0.40
codegen_flags: <defaults>
</compile_context>

<pallas_src>
import math
import functools

import jax
import jax.numpy as jnp
from jax.experimental import pallas as pl
from jax.experimental.pallas import tpu as pltpu


# ----------------------------------------------------------------------------
# Fused predictor kernel
# ----------------------------------------------------------------------------

def make_predictor_kernel(num_layers, num_graphs):
    """Fully fused Predictor forward.

    Inputs (refs, in order):
        adj      (N, N)  bf16 dense adjacency (duplicate edges summed, NO self-loop)
        x        (N, F)  f32 node features
        dinv     (N, 1)  f32 (deg + 1)^-1/2   (self-loop included in degree)
        bid      (N, 1)  i32 node -> graph id
        w_l      (d_l, d_{l+1})  bf16 GCN weights, l = 0..num_layers-1
        w_mean   (H, C)  bf16 top half of the MLP weight (mean features)
        w_max    (H, C)  bf16 bottom half of the MLP weight (max features)
        b        (1, C)  f32 MLP bias
    Output:
        out      (G, C)  sigmoid probabilities
    Scratch:
        pmean_sc (G, H)  f32, pmax_sc (G, H) f32
    """
    def kernel(adj_ref, x_ref, dinv_ref, bid_ref, *rest):
        gcn_w_refs = rest[:num_layers]
        wmean_ref, wmax_ref, b_ref, out_ref, pmean_sc, pmax_sc = rest[num_layers:]

        adj = adj_ref[...]                       # (N, N) bf16, stays untouched
        dinv = dinv_ref[...]                     # (N, 1) f32

        # GCN stack: relu(A_hat @ H @ W), self-loop folded into the matmul:
        #   A_hat @ H = dinv * (A @ (dinv*H) + dinv*H)
        h = x_ref[...].astype(jnp.float32)
        for layer in range(num_layers):
            hs = dinv * h                                                 # VPU f32
            ah = dinv * (jnp.dot(adj, hs.astype(jnp.bfloat16),
                                 preferred_element_type=jnp.float32)     # MXU bf16
                         + hs)
            h = jnp.maximum(
                jnp.dot(ah.astype(jnp.bfloat16), gcn_w_refs[layer][...],
                        preferred_element_type=jnp.float32), 0.0)

        # Readout: per-graph masked sum / max. O(N*H) live memory, no (G,N,H)
        # broadcast. Masked fill is 0.0 (valid because h >= 0 after ReLU; an
        # empty graph yields 0 for both mean and max).
        bid = bid_ref[...]                                                # (N, 1)

        @pl.loop(0, num_graphs)
        def _(g):
            mcol = jnp.where(bid == g, 1.0, 0.0)                          # (N, 1)
            hm = h * mcol                                                 # (N, H)
            cnt = jnp.maximum(jnp.sum(mcol), 1.0)
            pmean_sc[pl.ds(g, 1), :] = jnp.sum(hm, axis=0, keepdims=True) / cnt
            pmax_sc[pl.ds(g, 1), :] = jnp.max(hm, axis=0, keepdims=True)

        # MLP head: [mean | max] @ W + b with W pre-split (no lane concat).
        z = (jnp.dot(pmean_sc[...].astype(jnp.bfloat16), wmean_ref[...],
                     preferred_element_type=jnp.float32)
             + jnp.dot(pmax_sc[...].astype(jnp.bfloat16), wmax_ref[...],
                       preferred_element_type=jnp.float32)
             + b_ref[...])
        # sigmoid on the EUP slot: exp + approx reciprocal (no VPU divide)
        out_ref[...] = pl.reciprocal(1.0 + jnp.exp(-z),
                                     approx=True).astype(out_ref.dtype)

    return kernel


# ----------------------------------------------------------------------------
# Wrapper (XLA glue + single pallas_call)
# ----------------------------------------------------------------------------

@functools.partial(jax.jit, static_argnames=("num_graphs",))
def predictor_forward(params, x, edge_index, batch, num_graphs):
    n = x.shape[0]

    # TODO(synk): dense-adjacency scatter-add from edge_index has no clean
    # Pallas TPU equivalent (data-dependent scatter); kept as XLA glue.
    adj = jnp.zeros((n, n), jnp.bfloat16).at[
        edge_index[0], edge_index[1]].add(jnp.bfloat16(1.0))

    # deg = rowsum(A) + 1 (self-loop), computed O(E) next to the scatter so the
    # kernel never has to cast / row-reduce the (N,N) bf16 adjacency in f32.
    deg = jnp.ones((n, 1), jnp.float32).at[edge_index[0], 0].add(1.0)
    dinv = jax.lax.rsqrt(deg)                                # deg >= 1 always

    bid = batch.astype(jnp.int32).reshape(n, 1)

    gcn_ws = params["gcn_ws"]
    num_hidden = gcn_ws[-1].shape[1]
    gcn_ws_bf = [w.astype(jnp.bfloat16) for w in gcn_ws]
    mlp_w = params["mlp_w"]                                  # (2H, C)
    w_mean = mlp_w[:num_hidden].astype(jnp.bfloat16)
    w_max = mlp_w[num_hidden:].astype(jnp.bfloat16)
    num_classes = mlp_w.shape[1]

    # VMEM limit derived from the chip with headroom for Mosaic scratch and
    # I/O double buffers (~52 MiB on v7x, ~104 MiB on v5e/v6e).
    try:
        vmem_limit = int(pltpu.get_tpu_info().vmem_capacity_bytes * 13 // 16)
    except Exception:
        vmem_limit = None

    # Toy shapes: block == whole array easily fits VMEM.
    # TODO(synk): for non-toy N, keep adj at memory_space=pl.ANY and stream the
    # A @ (dinv*H) product with pltpu.emit_pipeline over MXU-aligned row tiles
    # (256 on v6e/v7x, 128 on v5e); pad H/C to multiples of 128 lanes; add a
    # 'parallel' grid axis so v7x's second TensorCore is used.
    return pl.pallas_call(
        make_predictor_kernel(len(gcn_ws), num_graphs),
        out_shape=jax.ShapeDtypeStruct((num_graphs, num_classes), jnp.float32),
        scratch_shapes=[pltpu.VMEM((num_graphs, num_hidden), jnp.float32),
                        pltpu.VMEM((num_graphs, num_hidden), jnp.float32)],
        compiler_params=pltpu.CompilerParams(vmem_limit_bytes=vmem_limit),
    )(adj, x.astype(jnp.float32), dinv, bid,
      *gcn_ws_bf, w_mean, w_max, params["mlp_b"])


# ----------------------------------------------------------------------------
# Parameter construction (deterministic)
# ----------------------------------------------------------------------------

def _xavier_uniform(key, shape, gain=1.0):
    fan_in, fan_out = shape[0], shape[1]
    bound = gain * math.sqrt(6.0 / (fan_in + fan_out))
    return jax.random.uniform(key, shape, jnp.float32, -bound, bound)


def init_predictor_params(key, num_features, num_hidden, layer_num,
                          num_classes=2):
    # TODO(synk): EncoderGCN is not defined in the reference file; assumed a
    # standard GCN stack relu(A_hat @ H @ W) with mean+max readout, which
    # matches the MLP input width of num_hidden * 2.
    ks = jax.random.split(key, layer_num + 2)
    dims = [num_features] + [num_hidden] * layer_num
    gcn_ws = [_xavier_uniform(ks[l], (dims[l], dims[l + 1]))
              for l in range(layer_num)]
    lin_in = num_hidden * 2
    lb = 1.0 / math.sqrt(lin_in)           # nn.Linear default init
    mlp_w = jax.random.uniform(ks[layer_num], (lin_in, num_classes),
                               jnp.float32, -lb, lb)
    mlp_b = jax.random.uniform(ks[layer_num + 1], (1, num_classes),
                               jnp.float32, -lb, lb)
    return {"gcn_ws": gcn_ws, "mlp_w": mlp_w, "mlp_b": mlp_b}


# ----------------------------------------------------------------------------
# Example run
# ----------------------------------------------------------------------------

if __name__ == "__main__":
    num_features = 8
    num_hidden = 16
    layer_num = 2
    num_classes = 2
    num_graphs = 3
    nodes_per_graph = 8
    N = num_graphs * nodes_per_graph        # 24 total nodes

    key = jax.random.PRNGKey(0)
    k_param, k_x = jax.random.split(key)
    params = init_predictor_params(k_param, num_features, num_hidden,
                                   layer_num, num_classes)

    # node features
    x = jax.random.normal(k_x, (N, num_features), jnp.float32)

    # undirected ring inside each graph
    edges = []
    for g in range(num_graphs):
        base = g * nodes_per_graph
        src = base + jnp.arange(nodes_per_graph, dtype=jnp.int32)
        dst = base + (jnp.arange(nodes_per_graph, dtype=jnp.int32) + 1) % nodes_per_graph
        edges.append(jnp.stack([src, dst]))
        edges.append(jnp.stack([dst, src]))
    edge_index = jnp.concatenate(edges, axis=1)          # (2, 48)

    # node -> graph assignment (PyG-style data.batch)
    batch = jnp.repeat(jnp.arange(num_graphs, dtype=jnp.int32),
                       nodes_per_graph)                   # (24,)

    out = predictor_forward(params, x, edge_index, batch, num_graphs)
    jax.block_until_ready(out)

    assert out.shape == (num_graphs, num_classes)
    # small tolerance: sigmoid uses EUP approx reciprocal
    assert bool(jnp.all((out >= -1e-2) & (out <= 1.0 + 1e-2)))
    print("KERNEL_OK")
</pallas_src>

<mosaic_0001>
module attributes {stable_mosaic.version = 11 : i64} {
  func.func private @main(%arg0: i32) attributes {dimension_semantics = [#tpu.dimension_semantics<core_parallel>], iteration_bounds = array<i64: 2>, tpu.core_type = #tpu.core_type<sc_scalar_subcore>, window_params = []} {
    return
  }
}

module attributes {stable_mosaic.version = 11 : i64} {
  func.func private @main(%arg0: i32) attributes {dimension_semantics = [#tpu.dimension_semantics<core_parallel>], iteration_bounds = array<i64: 2>, tpu.core_type = #tpu.core_type<sc_scalar_subcore>, window_params = []} {
    return
  }
}

module attributes {stable_mosaic.version = 11 : i64} {
  func.func @kernel(%arg0: memref<24x24xbf16, #tpu.memory_space<vmem>>, %arg1: memref<24x8xf32, #tpu.memory_space<vmem>>, %arg2: memref<24x1xf32, #tpu.memory_space<vmem>>, %arg3: memref<24x1xi32, #tpu.memory_space<vmem>>, %arg4: memref<8x16xbf16, #tpu.memory_space<vmem>>, %arg5: memref<16x16xbf16, #tpu.memory_space<vmem>>, %arg6: memref<16x2xbf16, #tpu.memory_space<vmem>>, %arg7: memref<16x2xbf16, #tpu.memory_space<vmem>>, %arg8: memref<1x2xf32, #tpu.memory_space<vmem>>, %arg9: memref<3x2xf32, #tpu.memory_space<vmem>>, %arg10: memref<3x16xf32, #tpu.memory_space<vmem>>, %arg11: memref<3x16xf32, #tpu.memory_space<vmem>>) attributes {dimension_semantics = [], scalar_prefetch = 0 : i64, scratch_operands = 2 : i64, tpu.core_type = #tpu.core_type<tc>} {
    %c0 = arith.constant 0 : index
    %c0_0 = arith.constant 0 : index
    %0 = vector.load %arg0[%c0, %c0_0] : memref<24x24xbf16, #tpu.memory_space<vmem>>, vector<24x24xbf16>
    %c0_1 = arith.constant 0 : index
    %c0_2 = arith.constant 0 : index
    %1 = vector.load %arg2[%c0_1, %c0_2] : memref<24x1xf32, #tpu.memory_space<vmem>>, vector<24x1xf32>
    %c0_3 = arith.constant 0 : index
    %c0_4 = arith.constant 0 : index
    %2 = vector.load %arg1[%c0_3, %c0_4] : memref<24x8xf32, #tpu.memory_space<vmem>>, vector<24x8xf32>
    %3 = vector.broadcast %1 : vector<24x1xf32> to vector<24x8xf32>
    %4 = arith.mulf %3, %2 : vector<24x8xf32>
    %5 = arith.truncf %4 : vector<24x8xf32> to vector<24x8xbf16>
    %cst = arith.constant dense<0.000000e+00> : vector<24x8xf32>
    %6 = tpu.matmul %0, %5, %cst {dimension_numbers = #tpu.dot_dimension_numbers<[1], [0], [0], [1], [0, 0, 1, 1], [], []>} : vector<24x24xbf16>, vector<24x8xbf16>, vector<24x8xf32> -> vector<24x8xf32>
    %7 = arith.addf %6, %4 : vector<24x8xf32>
    %8 = vector.broadcast %1 : vector<24x1xf32> to vector<24x8xf32>
    %9 = arith.mulf %8, %7 : vector<24x8xf32>
    %10 = arith.truncf %9 : vector<24x8xf32> to vector<24x8xbf16>
    %c0_5 = arith.constant 0 : index
    %c0_6 = arith.constant 0 : index
    %11 = vector.load %arg4[%c0_5, %c0_6] : memref<8x16xbf16, #tpu.memory_space<vmem>>, vector<8x16xbf16>
    %cst_7 = arith.constant dense<0.000000e+00> : vector<24x16xf32>
    %12 = tpu.matmul %10, %11, %cst_7 {dimension_numbers = #tpu.dot_dimension_numbers<[1], [0], [0], [1], [0, 0, 1, 1], [], []>} : vector<24x8xbf16>, vector<8x16xbf16>, vector<24x16xf32> -> vector<24x16xf32>
    %cst_8 = arith.constant 0.000000e+00 : f32
    %13 = vector.broadcast %cst_8 : f32 to vector<24x16xf32>
    %14 = arith.maximumf %12, %13 : vector<24x16xf32>
    %15 = vector.broadcast %1 : vector<24x1xf32> to vector<24x16xf32>
    %16 = arith.mulf %15, %14 : vector<24x16xf32>
    %17 = arith.truncf %16 : vector<24x16xf32> to vector<24x16xbf16>
    %cst_9 = arith.constant dense<0.000000e+00> : vector<24x16xf32>
    %18 = tpu.matmul %0, %17, %cst_9 {dimension_numbers = #tpu.dot_dimension_numbers<[1], [0], [0], [1], [0, 0, 1, 1], [], []>} : vector<24x24xbf16>, vector<24x16xbf16>, vector<24x16xf32> -> vector<24x16xf32>
    %19 = arith.addf %18, %16 : vector<24x16xf32>
    %20 = vector.broadcast %1 : vector<24x1xf32> to vector<24x16xf32>
    %21 = arith.mulf %20, %19 : vector<24x16xf32>
    %22 = arith.truncf %21 : vector<24x16xf32> to vector<24x16xbf16>
    %c0_10 = arith.constant 0 : index
    %c0_11 = arith.constant 0 : index
    %23 = vector.load %arg5[%c0_10, %c0_11] : memref<16x16xbf16, #tpu.memory_space<vmem>>, vector<16x16xbf16>
    %cst_12 = arith.constant dense<0.000000e+00> : vector<24x16xf32>
    %24 = tpu.matmul %22, %23, %cst_12 {dimension_numbers = #tpu.dot_dimension_numbers<[1], [0], [0], [1], [0, 0, 1, 1], [], []>} : vector<24x16xbf16>, vector<16x16xbf16>, vector<24x16xf32> -> vector<24x16xf32>
    %cst_13 = arith.constant 0.000000e+00 : f32
    %25 = vector.broadcast %cst_13 : f32 to vector<24x16xf32>
    %26 = arith.maximumf %24, %25 : vector<24x16xf32>
    %c0_14 = arith.constant 0 : index
    %c0_15 = arith.constant 0 : index
    %27 = vector.load %arg3[%c0_14, %c0_15] : memref<24x1xi32, #tpu.memory_space<vmem>>, vector<24x1xi32>
    %c0_i32 = arith.constant 0 : i32
    %c3_i32 = arith.constant 3 : i32
    %28 = arith.addi %c0_i32, %c3_i32 : i32
    %c1_i32 = arith.constant 1 : i32
    scf.for %arg12 = %c0_i32 to %28 step %c1_i32  : i32 {
      %c1_i32_33 = arith.constant 1 : i32
      %48 = arith.muli %arg12, %c1_i32_33 : i32
      %c0_i32_34 = arith.constant 0 : i32
      %49 = arith.addi %c0_i32_34, %48 : i32
      %50 = vector.broadcast %49 : i32 to vector<24x1xi32>
      %51 = arith.cmpi eq, %27, %50 : vector<24x1xi32>
      %cst_35 = arith.constant 1.000000e+00 : f32
      %cst_36 = arith.constant 0.000000e+00 : f32
      %52 = vector.broadcast %cst_35 : f32 to vector<24x1xf32>
      %53 = vector.broadcast %cst_36 : f32 to vector<24x1xf32>
      %54 = arith.select %51, %52, %53 : vector<24x1xi1>, vector<24x1xf32>
      %55 = vector.broadcast %54 : vector<24x1xf32> to vector<24x16xf32>
      %56 = arith.mulf %26, %55 : vector<24x16xf32>
      %57 = vector.shape_cast %54 : vector<24x1xf32> to vector<1x24x1xf32>
      %cst_37 = arith.constant dense<0.000000e+00> : vector<1xf32>
      %58 = vector.multi_reduction <add>, %57, %cst_37 [1, 2] : vector<1x24x1xf32> to vector<1xf32>
      %59 = vector.shape_cast %58 : vector<1xf32> to vector<1x1x1xf32>
      %60 = vector.extract %59[0, 0, 0] : f32 from vector<1x1x1xf32>
      %cst_38 = arith.constant 1.000000e+00 : f32
      %61 = arith.maximumf %60, %cst_38 : f32
      %cst_39 = arith.constant dense<0.000000e+00> : vector<16xf32>
      %62 = vector.multi_reduction <add>, %56, %cst_39 [0] : vector<24x16xf32> to vector<16xf32>
      %63 = vector.shape_cast %62 : vector<16xf32> to vector<1x16xf32>
      %64 = vector.broadcast %61 : f32 to vector<1x16xf32>
      %65 = arith.divf %63, %64 : vector<1x16xf32>
      %66 = arith.index_cast %49 : i32 to index
      %c0_40 = arith.constant 0 : index
      %67 = vector.load %arg10[%66, %c0_40] : memref<3x16xf32, #tpu.memory_space<vmem>>, vector<1x16xf32>
      tpu.vector_store %arg10[%66, %c0_40], %65 {strides = array<i32>} : memref<3x16xf32, #tpu.memory_space<vmem>>, vector<1x16xf32>,
      %cst_41 = arith.constant dense<0xFF800000> : vector<16xf32>
      %68 = vector.multi_reduction <maximumf>, %56, %cst_41 [0] : vector<24x16xf32> to vector<16xf32>
      %69 = vector.shape_cast %68 : vector<16xf32> to vector<1x16xf32>
      %70 = arith.index_cast %49 : i32 to index
      %c0_42 = arith.constant 0 : index
      %71 = vector.load %arg11[%70, %c0_42] : memref<3x16xf32, #tpu.memory_space<vmem>>, vector<1x16xf32>
      tpu.vector_store %arg11[%70, %c0_42], %69 {strides = array<i32>} : memref<3x16xf32, #tpu.memory_space<vmem>>, vector<1x16xf32>,
    }
    %c3_i32_16 = arith.constant 3 : i32
    %c0_17 = arith.constant 0 : index
    %c0_18 = arith.constant 0 : index
    %29 = vector.load %arg10[%c0_17, %c0_18] : memref<3x16xf32, #tpu.memory_space<vmem>>, vector<3x16xf32>
    %30 = arith.truncf %29 : vector<3x16xf32> to vector<3x16xbf16>
    %c0_19 = arith.constant 0 : index
    %c0_20 = arith.constant 0 : index
    %31 = vector.load %arg6[%c0_19, %c0_20] : memref<16x2xbf16, #tpu.memory_space<vmem>>, vector<16x2xbf16>
    %cst_21 = arith.constant dense<0.000000e+00> : vector<3x2xf32>
    %32 = tpu.matmul %30, %31, %cst_21 {dimension_numbers = #tpu.dot_dimension_numbers<[1], [0], [0], [1], [0, 0, 1, 1], [], []>} : vector<3x16xbf16>, vector<16x2xbf16>, vector<3x2xf32> -> vector<3x2xf32>
    %c0_22 = arith.constant 0 : index
    %c0_23 = arith.constant 0 : index
    %33 = vector.load %arg11[%c0_22, %c0_23] : memref<3x16xf32, #tpu.memory_space<vmem>>, vector<3x16xf32>
    %34 = arith.truncf %33 : vector<3x16xf32> to vector<3x16xbf16>
    %c0_24 = arith.constant 0 : index
    %c0_25 = arith.constant 0 : index
    %35 = vector.load %arg7[%c0_24, %c0_25] : memref<16x2xbf16, #tpu.memory_space<vmem>>, vector<16x2xbf16>
    %cst_26 = arith.constant dense<0.000000e+00> : vector<3x2xf32>
    %36 = tpu.matmul %34, %35, %cst_26 {dimension_numbers = #tpu.dot_dimension_numbers<[1], [0], [0], [1], [0, 0, 1, 1], [], []>} : vector<3x16xbf16>, vector<16x2xbf16>, vector<3x2xf32> -> vector<3x2xf32>
    %37 = arith.addf %32, %36 : vector<3x2xf32>
    %c0_27 = arith.constant 0 : index
    %c0_28 = arith.constant 0 : index
    %38 = vector.load %arg8[%c0_27, %c0_28] : memref<1x2xf32, #tpu.memory_space<vmem>>, vector<1x2xf32>
    %39 = vector.broadcast %38 : vector<1x2xf32> to vector<3x2xf32>
    %40 = arith.addf %37, %39 : vector<3x2xf32>
    %cst_29 = arith.constant 0.000000e+00 : f32
    %41 = vector.broadcast %cst_29 : f32 to vector<3x2xf32>
    %42 = arith.subf %41, %40 : vector<3x2xf32>
    %43 = math.exp %42 : vector<3x2xf32>
    %cst_30 = arith.constant 1.000000e+00 : f32
    %44 = vector.broadcast %cst_30 : f32 to vector<3x2xf32>
    %45 = arith.addf %44, %43 : vector<3x2xf32>
    %46 = tpu.reciprocal %45 {approx = true} : vector<3x2xf32> -> vector<3x2xf32>
    %c0_31 = arith.constant 0 : index
    %c0_32 = arith.constant 0 : index
    %47 = vector.load %arg9[%c0_31, %c0_32] : memref<3x2xf32, #tpu.memory_space<vmem>>, vector<3x2xf32>
    tpu.vector_store %arg9[%c0_31, %c0_32], %46 {strides = array<i32>} : memref<3x2xf32, #tpu.memory_space<vmem>>, vector<3x2xf32>,
    return
  }
}

</mosaic_0001>

<bundles_post_ra>
// kernel: predictor_forward.1
= control target key start
LH: loop header
LB: loop body
LE: loop exit
PB: predicated region body
PF: predicated region fallthrough
CT: control target
= control target key end

     0   :  { %v656_v0 = vmov 0   ;;  %vm70_vm0 = vcmask 195584   ;;  %vm77_vm1 = vcmask 1043456   ;;  %vm135_vm2 = vcmask 64512   ;;  %s796_s30 = smov 0   ;;  %s838_s2 = inlined_call_operand.vmem [shape: f32[24,1], index: 2, kind: input, shape index: {}]   ;;  %s839_s6 = inlined_call_operand.vmem [shape: bf16[16,2], index: 6, kind: input, shape index: {}]   ;;  %s840_s7 = inlined_call_operand.vmem [shape: bf16[16,2], index: 7, kind: input, shape index: {}]   ;;  %s841_s8 = inlined_call_operand.vmem [shape: f32[1,2], index: 8, kind: input, shape index: {}]   ;;  %s842_s9 = inlined_call_operand.vmem [shape: f32[3,2], index: 9, kind: output, shape index: {}]   ;;  %s843_s0 = inlined_call_operand.vmem [shape: bf16[24,24], index: 0, kind: input, shape index: {}]   ;;  %s844_s1 = inlined_call_operand.vmem [shape: f32[24,8], index: 1, kind: input, shape index: {}]   ;;  %s845_s4 = inlined_call_operand.vmem [shape: bf16[8,16], index: 4, kind: input, shape index: {}]   ;;  %s846_s5 = inlined_call_operand.vmem [shape: bf16[16,16], index: 5, kind: input, shape index: {}]   ;;  %s847_s3 = inlined_call_operand.vmem [shape: s32[24,1], index: 3, kind: input, shape index: {}]  }
   0x1   :  { %628 = vset.pattern.permute.xlu0 %v656_v0  ;;  %v36_v1 = vld [vmem:[%s838_s2] sm:$0xff]  ;;  %629 = vset.pattern.permute.xlu1 %v656_v0  ;;  %v38_v2 = vld [vmem:[%s838_s2 + $0x10] sm:$0xff]  ;;  %v37_v3 = vld [vmem:[%s838_s2 + $0x8] sm:$0xff]  ;;  %vm265_vm3 = vcmask 130048  }
   0x2   :  { %44 = vperm.xlu0 %628, %v36_v1   ;;  %54 = vperm.xlu1 %629, %v38_v2   ;;  %v630_v4 = vld [vmem:[%s843_s0] sm:$0xff]   ;;  %v41_v7 = vld [vmem:[%s844_s1 + $0x10] sm:$0xff]  ;;  %v40_v9 = vld [vmem:[%s844_s1 + $0x8] sm:$0xff] }
   0x3   :  { %573 = vmatprep.mubr.msk.bf16.mxu0 %vm70_vm0, %v630_v4  ;;  %v39_v8 = vld [vmem:[%s844_s1] sm:$0xff]  ;;  %v631_v17 = vld [vmem:[%s843_s0 + $0x8] ss:$0 sps:$4 sm:$0xff]   ;;  %v785_v60 = vld [vmem:[%s847_s3 + $0x10] sm:$0xff] }
   0x4   :  { %v134_v18 = vld [vmem:[%s845_s4] sm:$0xf]  ;;  %v780_v59 = vld [vmem:[%s847_s3 + $0x8] sm:$0xff] }
   0x5   :  { %610 = vmatprep.subr.msk.bf16.mxu1 %vm77_vm1, %v134_v18  ;;  %v143_v19 = vsel %vm77_vm1, %v134_v18, 0  ;;  %v632_v45 = vld [vmem:[%s846_s5] sm:$0xff]  }
   0x6   :  { %49 = vperm.xlu0 %628, %v37_v3   ;;  %578 = vmatpush3.bf16.msra.mxu1 %v143_v19  ;;  %v775_v58 = vld [vmem:[%s847_s3] sm:$0xff] }
  0x81   :  { %v725_v5 = vpop.permute.xlu0 %44  ;;  %v727_v6 = vpop.permute.xlu1 %54 }
  0x82   :  { %v59_v10 = vmul.f32 %v727_v6, %v41_v7  ;;  %v57_v12 = vmul.f32 %v725_v5, %v39_v8 }
  0x84   :  { %v61_v14 = vpack.c.bf16 %v59_v10, %v59_v10 }
  0x85   :  { %v739_v11 = vpop.permute.xlu0 %49 }
  0x86   :  { %v58_v13 = vmul.f32 %v739_v11, %v40_v9  ;;  %v79_v16 = vsel %vm77_vm1, %v61_v14, 0 }
  0x88   :  { %v60_v15 = vpack.c.bf16 %v58_v13, %v57_v12 }
  0x8a   :  { %569 = vmatprep.subr.bf16.mxu0 %v60_v15 }
  0x8b   :  { %570 = vmatpush3.bf16.msra.mxu0 %v60_v15 }
  0x8c   :  { %609 = vmatprep.subr.msk.bf16.mxu0 %vm77_vm1, %v61_v14 }
  0x8f   :  { %572 = vmatpush3.bf16.msra.mxu0 %v79_v16 }
  0x90   :  { %591 = vmatprep.subr.bf16.mxu0 %v632_v45 }
  0x92   :  { %574 = vmatmul.mubr.msk.bf16.vlgmr.msra.gmra.mrb[0].mxu0 %vm70_vm0, %v631_v17 }
  0x93   :  { %592 = vmatpush3.bf16.msra.mxu0 %v632_v45 }
 0x165   :  { %v575_v20 = vpop.f32.mrb[0].mxu0 }
 0x166   :  { %v124_v21 = vadd.f32 %v575_v20, %v59_v10  ;;  %v115_v22 = vpop.f32.mrb[1].mxu0 }
 0x167   :  { %v116_v23 = vadd.f32 %v115_v22, %v57_v12  ;;  %v576_v24 = vpop.f32.mrb[2].mxu0 }
 0x168   :  { %v118_v25 = vpop.f32.mrb[3].mxu0  ;;  %v131_v27 = vmul.f32 %v124_v21, %v727_v6 }
 0x169   :  { %v119_v26 = vadd.f32 %v118_v25, %v58_v13  ;;  %v129_v28 = vmul.f32 %v116_v23, %v725_v5 }
 0x16a   :  { %v133_v31 = vpack.c.bf16 %v131_v27, %v131_v27 }
 0x16b   :  { %v130_v29 = vmul.f32 %v119_v26, %v739_v11 }
 0x16d   :  { %v132_v30 = vpack.c.bf16 %v130_v29, %v129_v28 }
 0x16f   :  { %579 = vmatprep.mubr.msk.bf16.mxu1 %vm135_vm2, %v132_v30 }
 0x170   :  { %580 = vmatmul.mubr.msk.bf16.vlgmr.msra.gmra.mrb[0].mxu1 %vm135_vm2, %v133_v31 }
 0x171   :  { %587 = vmatprep.mubr.msk.bf16.mxu1 %vm70_vm0, %v630_v4 }
 0x243   :  { %v581_v32 = vpop.f32.mrb[0].mxu1 }
 0x244   :  { %v179_v33 = vpop.f32.mrb[1].mxu1  ;;  %v195_v34 = vmax.f32 %v581_v32, 0.0 }
 0x245   :  { %v193_v35 = vmax.f32 %v179_v33, 0.0  ;;  %v582_v36 = vpop.f32.mrb[2].mxu1 }
 0x246   :  { %v182_v37 = vpop.f32.mrb[3].mxu1  ;;  %v198_v39 = vmul.f32 %v195_v34, %v727_v6 }
 0x247   :  { %v194_v38 = vmax.f32 %v182_v37, 0.0  ;;  %v196_v40 = vmul.f32 %v193_v35, %v725_v5 }
 0x248   :  { %v200_v43 = vpack.c.bf16 %v198_v39, %v198_v39 }
 0x249   :  { %v197_v41 = vmul.f32 %v194_v38, %v739_v11 }
 0x24a   :  { %v202_v44 = vsel %vm77_vm1, %v200_v43, 0 }
 0x24b   :  { %v199_v42 = vpack.c.bf16 %v197_v41, %v196_v40 }
 0x24d   :  { %583 = vmatprep.subr.bf16.mxu1 %v199_v42 }
 0x24e   :  { %584 = vmatpush3.bf16.msra.mxu1 %v199_v42 }
 0x24f   :  { %611 = vmatprep.subr.msk.bf16.mxu1 %vm77_vm1, %v200_v43 }
 0x252   :  { %586 = vmatpush3.bf16.msra.mxu1 %v202_v44 }
 0x255   :  { %588 = vmatmul.mubr.msk.bf16.vlgmr.msra.gmra.mrb[4].mxu1 %vm70_vm0, %v631_v17 }
 0x328   :  { %v589_v46 = vpop.f32.mrb[4].mxu1 }
 0x329   :  { %v247_v47 = vadd.f32 %v589_v46, %v198_v39  ;;  %v238_v48 = vpop.f32.mrb[5].mxu1 }
 0x32a   :  { %v239_v49 = vadd.f32 %v238_v48, %v196_v40  ;;  %v590_v50 = vpop.f32.mrb[6].mxu1 }
 0x32b   :  { %v241_v51 = vpop.f32.mrb[7].mxu1  ;;  %v254_v53 = vmul.f32 %v247_v47, %v727_v6 }
 0x32c   :  { %v242_v52 = vadd.f32 %v241_v51, %v197_v41  ;;  %v252_v54 = vmul.f32 %v239_v49, %v725_v5 }
 0x32d   :  { %v256_v57 = vpack.c.bf16 %v254_v53, %v254_v53 }
 0x32e   :  { %v253_v55 = vmul.f32 %v242_v52, %v739_v11 }
 0x330   :  { %v255_v56 = vpack.c.bf16 %v253_v55, %v252_v54 }
 0x332   :  { %593 = vmatprep.mubr.msk.bf16.mxu0 %vm265_vm3, %v255_v56 }
 0x333   :  { %594 = vmatmul.mubr.msk.bf16.vlgmr.msra.gmra.mrb[4].mxu0 %vm265_vm3, %v256_v57 }
 0x406   :  { %v787_v61 = vpop.f32.mrb[4].mxu0 }
 0x407   :  { %v322_v62 = vmax.f32 %v787_v61, 0.0  ;;  %v790_v63 = vpop.f32.mrb[5].mxu0 }
 0x408   :  { %v320_v0 = vmax.f32 %v790_v63, 0.0  ;;  %v596_v1 = vpop.f32.mrb[6].mxu0 }
 0x409   :  { %v793_v2 = vpop.f32.mrb[7].mxu0 }
 0x40a   :  { %v321_v3 = vmax.f32 %v793_v2, 0.0 }
 0x40b LB: > { %v657_v4 = vmov 0   ;;  %v332_v5 = vstv %s654_s30  ;;  %vm357_vm4 = vcmask 7168   ;;  %v658_v6 = vmov 0.0   ;;  %s401_s3 = scalar_lea.vmem [#allocation3], %s654_s30  ;;  %s659_s11 = smov 1.0   ;;  %s654_s30 = sphi %s796_s30, %s331_s30  }
 0x40c   : > { %633 = vset.pattern.permute.xlu0 %v657_v4  ;;  %639 = vset.pattern.permute.xlu1 %v657_v4  ;;  %vm333_vm5 = vcmp.eq.s32.totalorder %v775_v58, %v332_v5  ;;  %vm334_vm6 = vcmp.eq.s32.totalorder %v780_v59, %v332_v5  ;;  %vm335_vm7 = vcmp.eq.s32.totalorder %v785_v60, %v332_v5  ;;  %vm388_vm8 = vcmask 122880   ;;  %s387_s13 = scalar_lea.vmem [#allocation2], %s654_s30  ;;  %s331_s30 = sadd.s32 1, %s654_s30  }
 0x40d   : > { %v336_v7 = vsel %vm333_vm5, 1.0, %v658_v6  ;;  %v337_v8 = vsel %vm334_vm6, 1.0, %v658_v6  ;;  %v338_v9 = vsel %vm335_vm7, 1.0, %v658_v6  ;;  %p328_p0 = scmp.ge.s32.totalorder %s331_s30, 3  }
 0x40e   : > { %v358_v10 = vsel %vm357_vm4, %v336_v7, 0.0  ;;  %v359_v11 = vsel %vm357_vm4, %v337_v8, 0.0  ;;  %v361_v12 = vsel %vm357_vm4, %v338_v9, 0.0  ;;  %351 = vperm.xlu1 %639, %v338_v9   ;;  %v634_v15 = vpack.i.bf16 %v337_v8, %v336_v7  ;;  %v642_v55 = vld [vmem:[%s840_s7] sm:$0xff] (%p328_p0)  }
 0x40f   : > { %v360_v13 = vadd.f32 %v359_v11, %v358_v10  ;;  %v660_v56 = vmov (%p328_p0), 0.0   ;;  %v643_v57 = vld [vmem:[%s839_s6] sm:$0xff] (%p328_p0)   ;;  %vm661_vm9 = vmmov (%p328_p0), 0   ;;  %vm522_vm10 = vcmask (%p328_p0), 10240  }
 0x410   :  { %597 = vmatprep.subr.bf16.mxu1 (%p328_p0), %v660_v56  ;;  %603 = vmatprep.subr.bf16.mxu0 (%p328_p0), %v660_v56  ;;  %v550_v60 = vld [vmem:[%s841_s8] ss:$0 sm:$0xff] (%p328_p0) }
 0x411   : > { %v362_v14 = vadd.f32 %v361_v12, %v360_v13  ;;  %598 = vmatpush3.bf16.msra.mxu1 (%p328_p0), %v642_v55  ;;  %599 = vmatprep.mubr.msk.bf16.mxu1 (%p328_p0), %vm661_vm9, %v660_v56 }
 0x412   :  { %604 = vmatpush3.bf16.msra.mxu0 (%p328_p0), %v643_v57  ;;  %605 = vmatprep.mubr.msk.bf16.mxu0 (%p328_p0), %vm661_vm9, %v660_v56 }
 0x413   : > { %363 = vadd.xlane.f32.xlu0 %v362_v14 }
 0x429   : > { %635 = vperm.xlu0 %633, %v634_v15  }
 0x48d   : > { %v352_v20 = vpop.permute.xlu1 %351 }
 0x48e   : > { %v356_v26 = vmul.f32 %v352_v20, %v322_v62 }
 0x490   : > { %v392_v32 = vsel %vm265_vm3, %v356_v26, -inf  ;;  %v376_v44 = vsel %vm265_vm3, %v356_v26, 0.0 }
 0x4a0   : > { %v364_v16 = vpop.xlane.xlu0 %363 }
 0x4a1   : > { %v365_v17 = vrot.slane %v364_v16, 4 }
 0x4a3   : > { %v366_v18 = vadd.f32 %v365_v17, %v364_v16 }
 0x4a5   : > { %v367_v19 = vrot.slane %v366_v18, 2 }
 0x4a7   : > { %v368_v21 = vadd.f32 %v367_v19, %v366_v18 }
 0x4a8   : > { %v636_v22 = vpop.permute.xlu0 %635 }
 0x4a9   : > { %v369_v23 = vrot.slane %v368_v21, 1  ;;  %v638_v24 = vunpack.i.h.bf16 %v636_v22  ;;  %v637_v25 = vunpack.i.l.bf16 %v636_v22 }
 0x4ab   : > { %v370_v27 = vadd.f32 %v369_v23, %v368_v21  ;;  %v355_v28 = vmul.f32 %v638_v24, %v321_v3  ;;  %v354_v29 = vmul.f32 %v637_v25, %v320_v0 }
 0x4ad   : > { %612 = vpush %v370_v27  ;;  %v391_v30 = vsel %vm265_vm3, %v355_v28, -inf  ;;  %v390_v31 = vsel %vm265_vm3, %v354_v29, -inf  ;;  %v374_v41 = vsel %vm265_vm3, %v355_v28, 0.0  ;;  %v373_v42 = vsel %vm265_vm3, %v354_v29, 0.0 }
 0x4ae   : > { %v393_v33 = vmax.f32 %v390_v31, %v391_v30  ;;  %v375_v43 = vadd.f32 %v374_v41, %v373_v42 }
 0x4b0   : > { %v394_v34 = vmax.f32 %v393_v33, %v392_v32  ;;  %v377_v45 = vadd.f32 %v376_v44, %v375_v43 }
 0x4b2   : > { %v395_v35 = vrot.slane %v394_v34, 4  ;;  %v378_v46 = vrot.slane %v377_v45, 4 }
 0x4b4   : > { %v396_v36 = vmax.f32 %v394_v34, %v395_v35  ;;  %v379_v47 = vadd.f32 %v378_v46, %v377_v45 }
 0x4b6   : > { %v397_v37 = vrot.slane %v396_v36, 2  ;;  %v380_v48 = vrot.slane %v379_v47, 2 }
 0x4b8   : > { %v398_v38 = vmax.f32 %v396_v36, %v397_v37  ;;  %v381_v50 = vadd.f32 %v380_v48, %v379_v47 }
 0x4ba   : > { %v399_v39 = vrot.slane %v398_v38, 1  ;;  %v382_v51 = vrot.slane %v381_v50, 1 }
 0x4bc   : > { %v400_v40 = vmax.f32 %v398_v38, %v399_v39  ;;  %v383_v52 = vadd.f32 %v382_v51, %v381_v50 }
 0x4be   : > { %402 = vst.msk [vmem:[%s401_s3] sm:$0x1] %vm388_vm8, %v400_v40 }
 0x4c5   :  { %v407_v1 = vld [vmem:[#allocation3] sm:$0x7] (%p328_p0) }
 0x4c6   :  { %v408_v5 = vpack.c.bf16 (%p328_p0), %v407_v1, %v407_v1 }
 0x4c8   :  { %600 = vmatmul.mubr.msk.bf16.vlgmr.msra.gmra.mrb[8].mxu1 (%p328_p0), %vm265_vm3, %v408_v5 }
 0x4de   : > { %s613_s10 = spop %612 }
 0x4df   : > { %s372_s12 = smax.f32 %s659_s11, %s613_s10 }
 0x4e0   : > { %v384_v49 = vstv %s372_s12 }
 0x4e1   : > { %640 = vrcp.f32 %v384_v49 }
 0x4e8   :  { %330 = sbr.rel (!%p328_p0) target bundleno = 1035 (0x40b), region = 65 }
 0x4eb   : > { %v641_v53 = vpop.eup %640 }
 0x4ec   : > { %v386_v54 = vmul.f32 %v641_v53, %v383_v52 }
 0x4ee   : > { %389 = vst.msk [vmem:[%s387_s13] sm:$0x1] %vm388_vm8, %v386_v54 }
 0x4f5   :  { %v403_v4 = vld [vmem:[#allocation2] sm:$0x7] }
 0x4f6   :  { %v404_v6 = vpack.c.bf16 %v403_v4, %v403_v4 }
 0x4f8   :  { %606 = vmatmul.mubr.msk.bf16.vlgmr.msra.gmra.mrb[8].mxu0 %vm265_vm3, %v404_v6 }
 0x59b   :  { %v454_v58 = vpop.f32.mrb[8].mxu1 }
 0x59c   :  { %v601_v61 = vpop.f32.mrb[9].mxu1 }
 0x59d   :  { %v457_v0 = vpop.f32.mrb[10].mxu1 }
 0x59e   :  { %v602_v3 = vpop.f32.mrb[11].mxu1 }
 0x5cb   :  { %v503_v59 = vpop.f32.mrb[8].mxu0 }
 0x5cc   :  { %v504_v62 = vadd.f32 %v503_v59, %v454_v58  ;;  %v607_v63 = vpop.f32.mrb[9].mxu0 }
 0x5cd   :  { %v506_v2 = vpop.f32.mrb[10].mxu0 }
 0x5ce   :  { %v516_v7 = vadd.f32 %v550_v60, %v504_v62  ;;  %v608_v8 = vpop.f32.mrb[11].mxu0 }
 0x5d0   :  { %v517_v9 = vsub.f32 0.0, %v516_v7 }
 0x5d2   :  { %v518_v10 = vmul.f32 1.442695, %v517_v9 }
 0x5d4   :  { %644 = vpow2.f32 %v518_v10 }
 0x5de   :  { %v645_v11 = vpop.eup %644 }
 0x5df   :  { %v520_v12 = vadd.f32 1.0, %v645_v11 }
 0x5e1   :  { %646 = vrcp.f32 %v520_v12 }
 0x5eb   :  { %v647_v13 = vpop.eup %646 }
 0x5ec   :  { %523 = vst.msk [vmem:[%s842_s9] sm:$0x7] %vm522_vm10, %v647_v13 }

</bundles_post_ra>
